<compile_context>
chip_gen: v7x
topology: tpu7x:2x2x1
jax: 0.10.0
libtpu: 0.0.40
codegen_flags: <defaults>
</compile_context>

<pallas_src>
import functools

import jax
import jax.numpy as jnp
from jax import lax
from jax.experimental import pallas as pl
from jax.experimental.pallas import tpu as pltpu


_MASK_FLOOR = -1e30  # finite floor used by the flash (no-probs) path


# ---------------------------------------------------------------------------
# Small helpers
# ---------------------------------------------------------------------------
def _vmem_budget():
    """Per-generation scoped-VMEM ceiling: capacity minus headroom."""
    cap = 64 << 20
    try:
        info = pltpu.get_tpu_info()
        cap = int(getattr(info, "vmem_capacity_bytes", cap))
    except Exception:
        pass
    return max(24 << 20, cap - (8 << 20))


def _vmem_limit(*byte_terms):
    need = int(sum(int(t) for t in byte_terms)) + (2 << 20)
    return int(max(16 << 20, min(need, _vmem_budget())))


def _block_spec(block_shape, index_map, *, single_buffer=False):
    """BlockSpec; single_buffer requests Buffered(1) for constant-index blocks."""
    if single_buffer:
        try:
            return pl.BlockSpec(block_shape, index_map,
                                pipeline_mode=pl.Buffered(1))
        except Exception:
            pass  # older jax without pipeline_mode -> plain (double-buffered) spec
    return pl.BlockSpec(block_shape, index_map)


def _tile_candidates(dim, max_tile):
    """Divisors of `dim` <= max_tile that are sublane friendly, descending."""
    cands = [d for d in range(1, dim + 1)
             if dim % d == 0 and d <= max_tile and (d % 8 == 0 or d == dim)]
    if not cands:
        cands = [dim]
    return sorted(set(cands), reverse=True)


def _first_fitting(cands, fits):
    for c in cands:
        if fits(c):
            return c
    return cands[-1]


# ---------------------------------------------------------------------------
# Row/column-tiled linear: y_i = x @ W_i + b_i for i in range(n_out)
#   x2d: (M, Din);  w3: (n_out, Din, d_each);  b3: (n_out, 1, d_each)
# Grid: (column tiles, row tiles) so the weight block stays resident across the
# inner row sweep; full weight kept resident (single column tile) when it fits.
# ---------------------------------------------------------------------------
def _linear_kernel(x_ref, w_ref, b_ref, *o_refs):
    x = x_ref[...]
    for i, o_ref in enumerate(o_refs):
        y = jnp.dot(x, w_ref[i], preferred_element_type=jnp.float32)
        o_ref[...] = (y + b_ref[i]).astype(o_ref.dtype)


def pallas_linear(x2d, w3, b3, *, row_tile=512):
    M, Din = x2d.shape
    n_out, _, d_each = w3.shape
    isz = x2d.dtype.itemsize
    wsz = w3.dtype.itemsize
    budget = _vmem_budget()

    # Row tile: keep >= 2 grid steps when possible (v7x megacore).
    tm = min(M, row_tile)
    if pl.cdiv(M, tm) < 2 and M > 8:
        tm = max(8, ((M // 2 + 7) // 8) * 8)

    # Column tile over d_each; keep the whole weight resident when it fits.
    def fits(tn):
        return (2 * tm * Din * isz              # x blocks (double-buffered)
                + 2 * n_out * Din * tn * wsz    # weight blocks (worst case 2x)
                + 2 * n_out * tn * 4            # bias
                + 2 * n_out * tm * tn * isz     # output blocks
                + n_out * tm * tn * 4) <= budget  # f32 temporaries
    col_cands = [d for d in _tile_candidates(d_each, d_each)
                 if d % 128 == 0 or d == d_each]
    tn = _first_fitting(col_cands, fits)

    nm = pl.cdiv(M, tm)
    nn = d_each // tn
    resident_w = nn == 1  # constant index map -> fetched once -> single buffer

    out_shape = tuple(jax.ShapeDtypeStruct((M, d_each), x2d.dtype)
                      for _ in range(n_out))
    out_specs = tuple(pl.BlockSpec((tm, tn), lambda j, i: (i, j))
                      for _ in range(n_out))

    vmem = _vmem_limit(
        2 * tm * Din * isz,
        (1 if resident_w else 2) * n_out * Din * tn * wsz,
        2 * n_out * tn * 4,
        2 * n_out * tm * tn * isz,
        n_out * tm * tn * 4,
    )

    return pl.pallas_call(
        _linear_kernel,
        out_shape=out_shape,
        grid=(nn, nm),
        in_specs=[
            pl.BlockSpec((tm, Din), lambda j, i: (i, 0)),
            _block_spec((n_out, Din, tn), lambda j, i: (0, 0, j),
                        single_buffer=resident_w),
            _block_spec((n_out, 1, tn), lambda j, i: (0, 0, j),
                        single_buffer=resident_w),
        ],
        out_specs=out_specs,
        compiler_params=pltpu.CompilerParams(
            dimension_semantics=("parallel", "parallel"),
            vmem_limit_bytes=vmem,
        ),
    )(x2d, w3, b3)


# ---------------------------------------------------------------------------
# Attention core.
# ---------------------------------------------------------------------------
def _pick_head_block(num_heads, head_dim):
    """Smallest head group whose lane width is 128-aligned (else all heads)."""
    for hb in range(1, num_heads + 1):
        if num_heads % hb == 0 and (hb * head_dim) % 128 == 0:
            return hb
    return num_heads  # lane width == embed_dim (full last dim, always legal)


def _probs_footprint(tq, Tk, dblk, hblk, isz, has_kpm, has_mask):
    return (2 * tq * dblk * isz                 # q blocks
            + 4 * Tk * dblk * isz               # k + v blocks
            + 2 * tq * dblk * isz               # context out
            + 2 * hblk * tq * Tk * isz          # attention-prob out
            + (2 * Tk * 4 if has_kpm else 0)
            + (2 * tq * Tk * 4 if has_mask else 0)
            + 6 * tq * Tk * 4                   # f32 score/softmax temporaries
            + hblk * tq * dblk * 4)             # f32 context temporaries


def _flash_footprint(tq, tk, dblk, hblk, hd, isz, has_kpm, has_mask):
    return (2 * tq * dblk * isz
            + 4 * tk * dblk * isz
            + 2 * tq * dblk * isz
            + (2 * tk * 4 if has_kpm else 0)
            + (2 * tq * tk * 4 if has_mask else 0)
            + 6 * tq * tk * 4
            + 2 * hblk * tq * (hd + 2) * 4)     # m/l/acc scratch + finalize temps


def _store_context(o_ref, ctx, hd):
    if len(ctx) == 1:
        o_ref[0] = ctx[0].astype(o_ref.dtype)
    elif hd % 128 == 0:
        # 128-lane aligned: direct per-head stores, no concat temporary.
        for j, c in enumerate(ctx):
            o_ref[0, :, j * hd:(j + 1) * hd] = c.astype(o_ref.dtype)
    else:
        # Not lane aligned: one lane-dense store of the whole head block.
        o_ref[0] = jnp.concatenate(ctx, axis=-1).astype(o_ref.dtype)


def _attention_probs_kernel(*refs, scale, hblk, hd, has_kpm, has_mask):
    it = iter(refs)
    q_ref, k_ref, v_ref = next(it), next(it), next(it)
    kpm_ref = next(it) if has_kpm else None
    mask_ref = next(it) if has_mask else None
    o_ref, attn_ref = next(it), next(it)

    q = q_ref[0] * scale                       # (tq, dblk): scale folded into q
    k = k_ref[0]                               # (Tk, dblk)
    v = v_ref[0]                               # (Tk, dblk)

    # Fold both masks into a single additive bias once per grid step.
    bias = None
    if has_kpm:
        bias = kpm_ref[0]                      # (1, Tk)
    if has_mask:
        mb = mask_ref[...]                     # (tq, Tk)
        bias = mb if bias is None else bias + mb

    ctx = []
    for j in range(hblk):                      # small unrolled per-head loop
        sl = slice(j * hd, (j + 1) * hd)
        s = lax.dot_general(q[:, sl], k[:, sl], (((1,), (1,)), ((), ())),
                            preferred_element_type=jnp.float32)
        if bias is not None:
            s = s + bias
        # NOTE: a fully-masked row yields NaN probabilities, same as PyTorch.
        mx = jnp.max(s, axis=-1, keepdims=True)
        e = jnp.exp(s - mx)
        p = e * pl.reciprocal(jnp.sum(e, axis=-1, keepdims=True), approx=True)
        attn_ref[0, j] = p.astype(attn_ref.dtype)
        ctx.append(jnp.dot(p.astype(v.dtype), v[:, sl],
                           preferred_element_type=jnp.float32))
    _store_context(o_ref, ctx, hd)


def _attention_flash_kernel(*refs, scale, hblk, hd, has_kpm, has_mask):
    it = iter(refs)
    q_ref, k_ref, v_ref = next(it), next(it), next(it)
    kpm_ref = next(it) if has_kpm else None
    mask_ref = next(it) if has_mask else None
    o_ref = next(it)
    m_sc, l_sc, acc_sc = next(it), next(it), next(it)

    ki = pl.program_id(3)

    @pl.when(ki == 0)
    def _():
        m_sc[...] = jnp.full(m_sc.shape, _MASK_FLOOR, dtype=m_sc.dtype)
        l_sc[...] = jnp.zeros(l_sc.shape, dtype=l_sc.dtype)
        acc_sc[...] = jnp.zeros(acc_sc.shape, dtype=acc_sc.dtype)

    q = q_ref[0] * scale                       # (tq, dblk)
    k = k_ref[0]                               # (tk, dblk)
    v = v_ref[0]                               # (tk, dblk)

    bias = None
    if has_kpm:
        bias = kpm_ref[0]                      # (1, tk)
    if has_mask:
        mb = mask_ref[...]                     # (tq, tk)
        bias = mb if bias is None else bias + mb

    for j in range(hblk):
        sl = slice(j * hd, (j + 1) * hd)
        s = lax.dot_general(q[:, sl], k[:, sl], (((1,), (1,)), ((), ())),
                            preferred_element_type=jnp.float32)
        if bias is not None:
            s = s + bias
        # Finite floor keeps the online softmax NaN-free when an entire Tk tile
        # of a row is masked.  Rows masked at *every* key return the mean of v
        # instead of PyTorch's NaN (acceptable for the no-probs fast path).
        s = jnp.maximum(s, _MASK_FLOOR)
        m_prev = m_sc[j]                                       # (tq, 1)
        m_new = jnp.maximum(m_prev, jnp.max(s, axis=-1, keepdims=True))
        alpha = jnp.exp(m_prev - m_new)
        p = jnp.exp(s - m_new)
        l_sc[j] = alpha * l_sc[j] + jnp.sum(p, axis=-1, keepdims=True)
        acc_sc[j] = alpha * acc_sc[j] + jnp.dot(p.astype(v.dtype), v[:, sl],
                                                preferred_element_type=jnp.float32)
        m_sc[j] = m_new

    @pl.when(ki == pl.num_programs(3) - 1)
    def _():
        ctx = [acc_sc[j] * pl.reciprocal(l_sc[j], approx=True)
               for j in range(hblk)]
        _store_context(o_ref, ctx, hd)


def pallas_attention(qp, kp, vp, kpm_bias, mask_bias, scale, num_heads, head_dim,
                     *, need_weights=True, q_block=None, k_block=None):
    """qp: (B, Tq, D); kp, vp: (B, Tk, D); kpm_bias: (B, 1, Tk) additive or None;
    mask_bias: (Tq, Tk) additive or None.
    Returns (context (B, Tq, D), attn (B, H, Tq, Tk) or None)."""
    B, Tq, D = qp.shape
    Tk = kp.shape[1]
    isz = qp.dtype.itemsize
    budget = _vmem_budget()
    has_kpm = kpm_bias is not None
    has_mask = mask_bias is not None

    hblk = _pick_head_block(num_heads, head_dim)
    hb_grid = num_heads // hblk
    dblk = hblk * head_dim
    q_cands = _tile_candidates(Tq, 512)

    if need_weights:
        # ------------------------------------------------------------------
        # Full-probability path (module semantics): grid (B, head-block, Tq).
        # TODO(synk): this path stores (B,H,Tq,Tk) probs (HBM-store bound);
        #             use need_weights=False for long sequences.
        # ------------------------------------------------------------------
        def fits(c):
            return _probs_footprint(c, Tk, dblk, hblk, isz,
                                    has_kpm, has_mask) <= budget
        tq = q_block if q_block is not None else _first_fitting(q_cands, fits)
        if tq % 8 != 0 and tq != Tq:
            tq = Tq
        nq = pl.cdiv(Tq, tq)

        in_specs = [
            pl.BlockSpec((1, tq, dblk), lambda b, h, qi: (b, qi, h)),
            pl.BlockSpec((1, Tk, dblk), lambda b, h, qi: (b, 0, h)),
            pl.BlockSpec((1, Tk, dblk), lambda b, h, qi: (b, 0, h)),
        ]
        args = [qp, kp, vp]
        if has_kpm:
            in_specs.append(pl.BlockSpec((1, 1, Tk), lambda b, h, qi: (b, 0, 0)))
            args.append(kpm_bias)
        if has_mask:
            in_specs.append(_block_spec((tq, Tk), lambda b, h, qi: (qi, 0),
                                        single_buffer=(nq == 1)))
            args.append(mask_bias)

        out_shape = (
            jax.ShapeDtypeStruct((B, Tq, D), qp.dtype),
            jax.ShapeDtypeStruct((B, num_heads, Tq, Tk), qp.dtype),
        )
        out_specs = (
            pl.BlockSpec((1, tq, dblk), lambda b, h, qi: (b, qi, h)),
            pl.BlockSpec((1, hblk, tq, Tk), lambda b, h, qi: (b, h, qi, 0)),
        )
        vmem = _vmem_limit(
            _probs_footprint(tq, Tk, dblk, hblk, isz, has_kpm, has_mask))
        kernel = functools.partial(
            _attention_probs_kernel, scale=scale, hblk=hblk, hd=head_dim,
            has_kpm=has_kpm, has_mask=has_mask)

        ctx, attn = pl.pallas_call(
            kernel,
            out_shape=out_shape,
            grid=(B, hb_grid, nq),
            in_specs=in_specs,
            out_specs=out_specs,
            compiler_params=pltpu.CompilerParams(
                dimension_semantics=("parallel", "parallel", "parallel"),
                vmem_limit_bytes=vmem,
            ),
        )(*args)
        return ctx, attn

    # ----------------------------------------------------------------------
    # No-probs flash path: Tk-tiled online softmax, no (B,H,Tq,Tk) store.
    # Grid (B, head-block, Tq, Tk); Tk is the innermost "arbitrary" axis.
    # ----------------------------------------------------------------------
    if has_kpm or has_mask:
        k_cands = [d for d in _tile_candidates(Tk, 1024)
                   if d % 128 == 0 or d == Tk]
    else:
        k_cands = _tile_candidates(Tk, 1024)
    tk = k_block if k_block is not None else k_cands[0]
    if (has_kpm or has_mask) and tk % 128 != 0 and tk != Tk:
        tk = Tk
    if Tk % tk != 0:
        tk = Tk
    nk = Tk // tk

    def fits(c):
        return _flash_footprint(c, tk, dblk, hblk, head_dim, isz,
                                has_kpm, has_mask) <= budget
    tq = q_block if q_block is not None else _first_fitting(q_cands, fits)
    if tq % 8 != 0 and tq != Tq:
        tq = Tq
    nq = pl.cdiv(Tq, tq)

    in_specs = [
        pl.BlockSpec((1, tq, dblk), lambda b, h, qi, ki: (b, qi, h)),
        pl.BlockSpec((1, tk, dblk), lambda b, h, qi, ki: (b, ki, h)),
        pl.BlockSpec((1, tk, dblk), lambda b, h, qi, ki: (b, ki, h)),
    ]
    args = [qp, kp, vp]
    if has_kpm:
        in_specs.append(pl.BlockSpec((1, 1, tk), lambda b, h, qi, ki: (b, 0, ki)))
        args.append(kpm_bias)
    if has_mask:
        in_specs.append(pl.BlockSpec((tq, tk), lambda b, h, qi, ki: (qi, ki)))
        args.append(mask_bias)

    out_shape = jax.ShapeDtypeStruct((B, Tq, D), qp.dtype)
    out_specs = pl.BlockSpec((1, tq, dblk), lambda b, h, qi, ki: (b, qi, h))
    vmem = _vmem_limit(
        _flash_footprint(tq, tk, dblk, hblk, head_dim, isz, has_kpm, has_mask))
    kernel = functools.partial(
        _attention_flash_kernel, scale=scale, hblk=hblk, hd=head_dim,
        has_kpm=has_kpm, has_mask=has_mask)

    ctx = pl.pallas_call(
        kernel,
        out_shape=out_shape,
        grid=(B, hb_grid, nq, nk),
        in_specs=in_specs,
        out_specs=out_specs,
        scratch_shapes=[
            pltpu.VMEM((hblk, tq, 1), jnp.float32),         # running max
            pltpu.VMEM((hblk, tq, 1), jnp.float32),         # running denom
            pltpu.VMEM((hblk, tq, head_dim), jnp.float32),  # running context
        ],
        compiler_params=pltpu.CompilerParams(
            dimension_semantics=("parallel", "parallel", "parallel", "arbitrary"),
            vmem_limit_bytes=vmem,
        ),
    )(*args)
    return ctx, None


# ---------------------------------------------------------------------------
# Module wrapper
# ---------------------------------------------------------------------------
class MultiHeadAttentionPallas:
    def __init__(self, embed_dim: int, num_heads: int, key, dtype=jnp.float32):
        assert embed_dim % num_heads == 0
        self.embed_dim = embed_dim
        self.num_heads = num_heads
        self.head_dim = embed_dim // num_heads
        self.dtype = dtype

        ks = jax.random.split(key, 8)
        init = lambda k, shape: (jax.random.normal(k, shape, jnp.float32)
                                 * 0.05).astype(dtype)
        # stored as (D_in, D_out) == torch W.T
        self.wq, self.bq = init(ks[0], (embed_dim, embed_dim)), init(ks[1], (1, embed_dim))
        self.wk, self.bk = init(ks[2], (embed_dim, embed_dim)), init(ks[3], (1, embed_dim))
        self.wv, self.bv = init(ks[4], (embed_dim, embed_dim)), init(ks[5], (1, embed_dim))
        self.wo, self.bo = init(ks[6], (embed_dim, embed_dim)), init(ks[7], (1, embed_dim))

        # Stacked (n_out, Din, Dout) weights for fused single-launch projections.
        self.w_qkv = jnp.stack([self.wq, self.wk, self.wv], axis=0)
        self.b_qkv = jnp.stack([self.bq, self.bk, self.bv], axis=0)
        self.w_kv = jnp.stack([self.wk, self.wv], axis=0)
        self.b_kv = jnp.stack([self.bk, self.bv], axis=0)
        self.w_q1, self.b_q1 = self.wq[None], self.bq[None]
        self.w_k1, self.b_k1 = self.wk[None], self.bk[None]
        self.w_v1, self.b_v1 = self.wv[None], self.bv[None]
        self.w_o1, self.b_o1 = self.wo[None], self.bo[None]

    def __call__(self, q, k, v, mask=None, key_padding_mask=None, *,
                 need_weights=True, q_block=None, k_block=None):
        B, T_q, D = q.shape
        _, T_k, _ = k.shape
        assert k.shape[1] == v.shape[1], "Sequence lengths of k and v must match"
        H, hd = self.num_heads, self.head_dim
        scale = 1.0 / (hd ** 0.5)

        same_qkv = (q is k) and (k is v)
        same_kv = k is v

        q2 = q.astype(self.dtype).reshape(B * T_q, D)
        k2 = k.astype(self.dtype).reshape(B * T_k, D)
        v2 = v.astype(self.dtype).reshape(B * T_k, D)

        # Fused projections when inputs coincide (activations read once,
        # one kernel launch instead of three).
        if same_qkv:
            qp, kp, vp = pallas_linear(q2, self.w_qkv, self.b_qkv)
        elif same_kv:
            (qp,) = pallas_linear(q2, self.w_q1, self.b_q1)
            kp, vp = pallas_linear(k2, self.w_kv, self.b_kv)
        else:
            (qp,) = pallas_linear(q2, self.w_q1, self.b_q1)
            (kp,) = pallas_linear(k2, self.w_k1, self.b_k1)
            (vp,) = pallas_linear(v2, self.w_v1, self.b_v1)

        qp = qp.reshape(B, T_q, D)
        kp = kp.reshape(B, T_k, D)
        vp = vp.reshape(B, T_k, D)

        # Tiny additive biases instead of a materialized (B, Tq, Tk) f32 bias.
        kpm_bias = None
        if key_padding_mask is not None:          # (B, T_k) bool, True = masked
            kpm_bias = jnp.where(key_padding_mask, -jnp.inf, 0.0
                                 ).astype(jnp.float32)[:, None, :]          # (B,1,Tk)
        mask_bias = None
        if mask is not None:                      # (T_q, T_k) bool, True = masked
            mask_bias = jnp.where(mask, -jnp.inf, 0.0).astype(jnp.float32)  # (Tq,Tk)

        ctx, attn = pallas_attention(qp, kp, vp, kpm_bias, mask_bias, scale, H, hd,
                                     need_weights=need_weights,
                                     q_block=q_block, k_block=k_block)

        # Context is already in (B, T_q, D) head-major layout; no transpose needed.
        (out,) = pallas_linear(ctx.reshape(B * T_q, D), self.w_o1, self.b_o1)
        return out.reshape(B, T_q, D), attn


# ---------------------------------------------------------------------------
# Pure-JAX reference for verification (always f32)
# ---------------------------------------------------------------------------
def reference_forward(m, q, k, v, mask=None, key_padding_mask=None):
    f32 = jnp.float32
    wq, wk, wv, wo = (w.astype(f32) for w in (m.wq, m.wk, m.wv, m.wo))
    bq, bk, bv, bo = (b.astype(f32) for b in (m.bq, m.bk, m.bv, m.bo))
    B, T_q, D = q.shape
    T_k = k.shape[1]
    H, hd = m.num_heads, m.head_dim
    qp = q @ wq + bq
    kp = k @ wk + bk
    vp = v @ wv + bv
    qh = qp.reshape(B, T_q, H, hd).transpose(0, 2, 1, 3)
    kh = kp.reshape(B, T_k, H, hd).transpose(0, 2, 1, 3)
    vh = vp.reshape(B, T_k, H, hd).transpose(0, 2, 1, 3)
    s = jnp.einsum("bhqd,bhkd->bhqk", qh, kh) / (hd ** 0.5)
    if key_padding_mask is not None:
        s = jnp.where(key_padding_mask[:, None, None, :], -jnp.inf, s)
    if mask is not None:
        s = jnp.where(mask[None, None, :, :], -jnp.inf, s)
    p = jax.nn.softmax(s, axis=-1)
    o = jnp.einsum("bhqk,bhkd->bhqd", p, vh)
    o = o.transpose(0, 2, 1, 3).reshape(B, T_q, D)
    return o @ wo + bo, p


if __name__ == "__main__":
    B, T, D, H = 2, 16, 32, 4
    key = jax.random.PRNGKey(0)
    kq, kk, kv, kparams = jax.random.split(key, 4)

    q = jax.random.normal(kq, (B, T, D), jnp.float32)
    k = jax.random.normal(kk, (B, T, D), jnp.float32)
    v = jax.random.normal(kv, (B, T, D), jnp.float32)

    mha = MultiHeadAttentionPallas(D, H, kparams)

    # 1) cross-attention, separate q/k/v projections, full probs returned
    out, attn = mha(q, k, v)
    jax.block_until_ready((out, attn))
    out_ref, attn_ref = reference_forward(mha, q, k, v)
    assert jnp.allclose(out, out_ref, atol=5e-3, rtol=5e-3)
    assert jnp.allclose(attn, attn_ref, atol=5e-3, rtol=5e-3)

    # 2) self-attention (fused QKV) with causal + key-padding masks,
    #    Tq-tiled probs path (q_block=8 -> 2 query tiles per head block)
    causal = jnp.triu(jnp.ones((T, T), dtype=bool), k=1)
    kpm = jnp.zeros((B, T), dtype=bool).at[1, T - 2:].set(True)
    out2, attn2 = mha(q, q, q, mask=causal, key_padding_mask=kpm, q_block=8)
    jax.block_until_ready((out2, attn2))
    out2_ref, attn2_ref = reference_forward(mha, q, q, q, mask=causal,
                                            key_padding_mask=kpm)
    assert jnp.allclose(out2, out2_ref, atol=5e-3, rtol=5e-3)
    assert jnp.allclose(attn2, attn2_ref, atol=5e-3, rtol=5e-3)

    # 3) no-probs flash path with the same masks (probs never materialized)
    out3, attn3 = mha(q, q, q, mask=causal, key_padding_mask=kpm,
                      need_weights=False, q_block=8)
    jax.block_until_ready(out3)
    assert attn3 is None
    assert jnp.allclose(out3, out2_ref, atol=5e-3, rtol=5e-3)

    # 4) bf16 end-to-end, multi-tile online softmax (q_block=8, k_block=8)
    mha16 = MultiHeadAttentionPallas(D, H, kparams, dtype=jnp.bfloat16)
    out4, attn4 = mha16(q, q, q, need_weights=False, q_block=8, k_block=8)
    jax.block_until_ready(out4)
    assert attn4 is None
    out4_ref, _ = reference_forward(mha16, q, q, q)
    assert jnp.allclose(out4.astype(jnp.float32), out4_ref, atol=3e-2, rtol=3e-2)

    print("KERNEL_OK")
</pallas_src>

<mosaic_0001>
module attributes {stable_mosaic.version = 11 : i64} {
  func.func @_linear_kernel(%arg0: i32, %arg1: i32, %arg2: memref<16x32xf32, #tpu.memory_space<vmem>>, %arg3: memref<1x32x32xf32, #tpu.memory_space<vmem>>, %arg4: memref<1x1x32xf32, #tpu.memory_space<vmem>>, %arg5: memref<16x32xf32, #tpu.memory_space<vmem>>) attributes {dimension_semantics = [#tpu.dimension_semantics<parallel>, #tpu.dimension_semantics<parallel>], iteration_bounds = array<i64: 1, 2>, scalar_prefetch = 0 : i64, scratch_operands = 0 : i64, tpu.core_type = #tpu.core_type<tc>, window_params = [{transform_indices = @transform_0, window_bounds = array<i64: 16, 32>}, {pipeline_mode = #tpu.pipeline_mode<synchronous>, transform_indices = @transform_1, window_bounds = array<i64: 1, 32, 32>}, {pipeline_mode = #tpu.pipeline_mode<synchronous>, transform_indices = @transform_2, window_bounds = array<i64: 1, 1, 32>}, {transform_indices = @transform_3, window_bounds = array<i64: 16, 32>}]} {
    %c0 = arith.constant 0 : index
    %c0_0 = arith.constant 0 : index
    %0 = vector.load %arg2[%c0, %c0_0] : memref<16x32xf32, #tpu.memory_space<vmem>>, vector<16x32xf32>
    %c0_1 = arith.constant 0 : index
    %c0_2 = arith.constant 0 : index
    %c0_3 = arith.constant 0 : index
    %1 = vector.load %arg3[%c0_1, %c0_2, %c0_3] : memref<1x32x32xf32, #tpu.memory_space<vmem>>, vector<1x32x32xf32>
    %2 = vector.shape_cast %1 : vector<1x32x32xf32> to vector<32x32xf32>
    %cst = arith.constant dense<0.000000e+00> : vector<16x32xf32>
    %3 = tpu.matmul %0, %2, %cst {dimension_numbers = #tpu.dot_dimension_numbers<[1], [0], [0], [1], [0, 0, 1, 1], [], []>} : vector<16x32xf32>, vector<32x32xf32>, vector<16x32xf32> -> vector<16x32xf32>
    %c0_4 = arith.constant 0 : index
    %c0_5 = arith.constant 0 : index
    %c0_6 = arith.constant 0 : index
    %4 = vector.load %arg4[%c0_4, %c0_5, %c0_6] : memref<1x1x32xf32, #tpu.memory_space<vmem>>, vector<1x1x32xf32>
    %5 = vector.shape_cast %4 : vector<1x1x32xf32> to vector<1x32xf32>
    %6 = vector.broadcast %5 : vector<1x32xf32> to vector<16x32xf32>
    %7 = arith.addf %3, %6 : vector<16x32xf32>
    %c0_7 = arith.constant 0 : index
    %c0_8 = arith.constant 0 : index
    %8 = vector.load %arg5[%c0_7, %c0_8] : memref<16x32xf32, #tpu.memory_space<vmem>>, vector<16x32xf32>
    tpu.vector_store %arg5[%c0_7, %c0_8], %7 {strides = array<i32>} : memref<16x32xf32, #tpu.memory_space<vmem>>, vector<16x32xf32>,
    return
  }
  func.func @transform_0(%arg0: i32, %arg1: i32) -> (i32, i32) {
    %c0_i32 = arith.constant 0 : i32
    %c0_i32_0 = arith.constant 0 : i32
    return %arg1, %c0_i32 : i32, i32
  }
  func.func @transform_1(%arg0: i32, %arg1: i32) -> (i32, i32, i32) {
    %c0_i32 = arith.constant 0 : i32
    %c0_i32_0 = arith.constant 0 : i32
    %c0_i32_1 = arith.constant 0 : i32
    return %c0_i32, %c0_i32_0, %arg0 : i32, i32, i32
  }
  func.func @transform_2(%arg0: i32, %arg1: i32) -> (i32, i32, i32) {
    %c0_i32 = arith.constant 0 : i32
    %c0_i32_0 = arith.constant 0 : i32
    %c0_i32_1 = arith.constant 0 : i32
    return %c0_i32, %c0_i32_0, %arg0 : i32, i32, i32
  }
  func.func @transform_3(%arg0: i32, %arg1: i32) -> (i32, i32) {
    %c0_i32 = arith.constant 0 : i32
    return %arg1, %arg0 : i32, i32
  }
}

</mosaic_0001>

<bundles_post_ra>
// kernel: tpu_custom_call.1
= control target key start
LH: loop header
LB: loop body
LE: loop exit
PB: predicated region body
PF: predicated region fallthrough
CT: control target
= control target key end

     0   :  { %8 = vsyncpa [#allocation3], 0  ;;  %s990_s0 = inlined_call_operand.hbm [shape: f32[32,32], index: 0, kind: input, shape index: {}]   ;;  %s991_s1 = inlined_call_operand.hbm [shape: f32[1,32,32], index: 1, kind: input, shape index: {}]   ;;  %s992_s2 = inlined_call_operand.vmem [shape: f32[1,1,32], index: 2, kind: input, shape index: {}]   ;;  %s993_s3 = inlined_call_operand.hbm [shape: f32[32,32], index: 3, kind: output, shape index: {}]  }
   0x1   :  { %10 = vsyncpa [#allocation3 + $0x1], 0 }
   0x2   :  { %11 = vsyncpa [#allocation6], 0 }
   0x3   :  { %12 = vsyncpa [#allocation4], 0 }
   0x4   :  { %14 = vsyncpa [#allocation4 + $0x1], 0  ;;  %s758_s12 = smov 0   ;;  %s760_s13 = smov 0  }
   0x5   :  { %s762_s14 = smov 0   ;;  %s764_s15 = smov 0  }
   0x6   :  { %s766_s16 = smov 0   ;;  %s768_s17 = smov 0  }
   0x7 LB: > { %s460_s18 = sadd.s32 4294967295, %s729_s17   ;;  %s461_s19 = sadd.s32 4294967294, %s729_s17   ;;  %s729_s17 = sphi %s768_s17, %s20_s17   ;;  %s725_s16 = sphi %s766_s16, %s1017_s16   ;;  %s721_s15 = sphi %s764_s15, %s1016_s15   ;;  %s717_s14 = sphi %s762_s14, %s1015_s14   ;;  %s713_s13 = sphi %s760_s13, %s1014_s13   ;;  %s709_s12 = sphi %s758_s12, %s1013_s12  }
   0x8   : > { %p52_p0 = scmp.ne.s32.totalorder %s713_s13, %s709_s12  ;;  %p792_p1 = scmp.eq.s32.totalorder %s460_s18, 0 }
   0x9   : > { %p796_p2 = scmp.eq.s32.totalorder %s460_s18, 1  ;;  %p136_p3 = scmp.eq.s32.totalorder %s461_s19, 1 }
   0xa   : > { %s998_s20 = scalar_select %p792_p1, 1, 0 }
   0xb   : > { %s999_s21 = scalar_select %p796_p2, 1, 0 }
   0xc   : > { %p802_p4 = por %p792_p1, %p52_p0  ;;  %p462_p5 = scmp.ge.s32.totalorder %s729_s17, 1 }
   0xd   : > { %p807_p6 = por %p136_p3, %p52_p0  ;;  %p143_p7 = scmp.lt.s32.totalorder %s729_s17, 3 }
   0xe   : > { %s1000_s22 = scalar_select %p802_p4, 1, 0 }
   0xf   : > { %s1001_s23 = scalar_select %p807_p6, 1, 0 }
  0x10   : > { %p812_p8 = pnand %p462_p5, %p143_p7  ;;  %s731_s25 = smov [#allocation5]  }
  0x11   : > { %s157_s26 = sshll.u32 %s731_s25, 4  ;;  %s29_s28 = sadd.s32 1, %s725_s16  ;;  %s158_s26 = int_to_ptr.vmem [resolvable:$true] %s157_s26 }
  0x12   : > { %s1002_s24 = scalar_select %p812_p8, 1, 0 }
  0x13   : > { %p516_p9 = pneg %p812_p8  ;;  %s585_s4 = scalar_lea.hbm %s991_s1, 512 }
  0x14   : > { %p586_p12 = scmp.ne.s32.totalorder %s991_s1, %s585_s4  ;;  %p592_p5 = scmp.lt.u32.totalorder %s585_s4, %s991_s1 }
  0x15   : > { %p821_p11 = pnand %p516_p9, %p792_p1 }
  0x17   : > { %p587_p13 = pneg %p821_p11 }
  0x19   : > { %p588_p0 = pnand %p587_p13, %p586_p12 }
  0x1b   : > { %p589_p3 = pneg %p588_p0 }
  0x1d   : > { %p594_p7 = pnand %p592_p5, %p589_p3 }
  0x1f   : > { %597 = shalt.err (!%p594_p7)
}
  0x20   : > { %s598_s9 = scalar_lea.vmem %s158_s26, 512  ;;  %p606_p1 = scmp.lt.s32.totalorder %s158_s26, %s158_s26 }
  0x21   : > { %p599_p9 = scmp.ne.s32.totalorder %s158_s26, %s598_s9  ;;  %p607_p4 = scmp.lt.s32.totalorder %s598_s9, %s598_s9 }
  0x23   : > { %p601_p10 = pnand %p599_p9, %p587_p13  ;;  %p608_p8 = por %p607_p4, %p606_p1 }
  0x25   : > { %p602_p6 = pneg %p601_p10 }
  0x27   : > { %p609_p2 = pnand %p608_p8, %p602_p6 }
  0x29   : > { %612 = shalt.err (!%p609_p2)
}
  0x2a   : > { %s732_s10 = smov 128   ;;  %s733_s11 = smov 8  }
  0x2b   : > { %519 = dma.hbm_to_vmem [thread:$0]  (!%p821_p11), %s991_s1, 512, %s158_s26, [#allocation6], %s732_s10, %s732_s10, %s733_s11  }
  0x2c   : > { %p30_p1 = scmp.ge.s32.totalorder %s29_s28, 2  ;;  %s39_s25 = sadd.s32 1, %s717_s14 }
  0x2d   : > { %p46_p2 = scmp.ne.s32.totalorder %s717_s14, %s713_s13  ;;  %p47_p4 = scmp.eq.s32.totalorder %s729_s17, 0 }
  0x2e   : > { %s1019_s28 = smov (%p30_p1, %s29_s28), 0  ;;  %p1005_p8 = scmp.ne.s32.totalorder %s999_s21, 0 }
  0x2f   : > { %p851_p6 = por %p47_p4, %p46_p2  ;;  %s36_s30 = ssub.s32 %s725_s16, %s1019_s28 }
  0x30   : > { %p857_p10 = por %p1005_p8, %p46_p2  ;;  %p529_p12 = scmp.lt.s32.totalorder %s729_s17, 2 }
  0x31   : > { %p37_p11 = scmp.eq.s32.totalorder %s36_s30, 0  ;;  %s177_s26 = sand.u32 1, %s717_s14  }
  0x32   : > { %s466_s4 = sshll.u32 %s177_s26, 4  ;;  %s481_s6 = sshll.u32 %s725_s16, 8 }
  0x33   : > { %s866_s5 = scalar_select %p37_p11, %s717_s14, %s39_s25  }
  0x34   : > { %s872_s9 = scalar_lea.hbm %s990_s0, %s481_s6  ;;  %s181_s21 = scalar_lea.vmem [#allocation2], %s466_s4 }
  0x35   : > { %s188_s18 = sshll.u32 %s181_s21, 4  ;;  %p878_p13 = pnand %p529_p12, %p851_p6  ;;  %s874_s18 = int_to_ptr.vmem [resolvable:$true] %s188_s18 }
  0x36   : > { %s882_s25 = scalar_lea.sflag [#allocation3], %s177_s26  ;;  %s613_s30 = scalar_lea.hbm %s872_s9, 256 }
  0x37   : > { %p614_p0 = scmp.ne.s32.totalorder %s872_s9, %s613_s30  ;;  %p615_p3 = pneg %p878_p13 }
  0x38   : > { %s618_s29 = scalar_lea.hbm %s990_s0, 512  ;;  %p619_p9 = scmp.lt.u32.totalorder %s872_s9, %s990_s0 }
  0x39   : > { %p616_p5 = pnand %p615_p3, %p614_p0  ;;  %p620_p1 = scmp.lt.u32.totalorder %s618_s29, %s613_s30 }
  0x3a   : > { %p622_p4 = scmp.lt.u32.totalorder %s613_s30, %s872_s9 }
  0x3b   : > { %p617_p7 = pneg %p616_p5  ;;  %p621_p2 = por %p620_p1, %p619_p9 }
  0x3d   : > { %p623_p6 = por %p622_p4, %p621_p2 }
  0x3f   : > { %p624_p8 = pnand %p623_p6, %p617_p7 }
  0x41   : > { %627 = shalt.err (!%p624_p8)
}
  0x42   : > { %s628_s26 = scalar_lea.vmem %s874_s18, 256  ;;  %s734_s21 = smov [#allocation2]  }
  0x43   : > { %p629_p12 = scmp.ne.s32.totalorder %s874_s18, %s628_s26  ;;  %s633_s4 = sshll.u32 %s734_s21, 4  ;;  %s634_s4 = int_to_ptr.vmem [resolvable:$false] %s633_s4 }
  0x44   : > { %s635_s6 = scalar_lea.vmem %s634_s4, 512  ;;  %p636_p5 = scmp.lt.s32.totalorder %s874_s18, %s634_s4 }
  0x45   : > { %p631_p11 = pnand %p629_p12, %p615_p3  ;;  %p637_p9 = scmp.lt.s32.totalorder %s635_s6, %s628_s26 }
  0x47   : > { %p632_p0 = pneg %p631_p11  ;;  %p638_p1 = por %p637_p9, %p636_p5 }
  0x49   : > { %p639_p2 = pnand %p638_p1, %p632_p0 }
  0x4b   : > { %642 = shalt.err (!%p639_p2)
}
  0x4c   : > { %523 = dma.hbm_to_vmem [thread:$0]  (!%p878_p13), %s872_s9, 256, %s874_s18, %s882_s25, %s732_s10, %s732_s10, %s733_s11  }
  0x4d   : > { %p1008_p3 = scmp.ne.s32.totalorder %s1002_s24, 0 }
  0x4e   : > { %s916_s30 = sand.u32 (!%p1008_p3), 1, %s713_s13   ;;  %p1009_p7 = scmp.ne.s32.totalorder (!%p1008_p3), %s1000_s22, 0 }
  0x4f   : > { %200 = sbr.rel (%p1008_p3) target bundleno = 331 (0x14b), region = 32  ;;  %s470_s29 = sshll.u32 (!%p1008_p3), %s916_s30, 4 }
  0x50   : > { %s203_s7 = scalar_lea.sflag (!%p1008_p3), [#allocation3], %s916_s30  ;;  %s206_s8 = scalar_lea.vmem (!%p1008_p3), [#allocation2], %s470_s29 }
  0x56   : > { %696 = dma.done.wait (%p1009_p7), %s203_s7, 256  }
  0x57   : > { %698 = vsyncadd (%p1009_p7), %s203_s7, 4294967040  ;;  %p1010_p4 = scmp.ne.s32.totalorder %s998_s20, 0 }
  0x59   : > { %700 = dma.done.wait (%p1010_p4), [#allocation6], 512  }
  0x5a   : > { %702 = vsyncadd (%p1010_p4), [#allocation6], 4294966784  ;;  %vm254_vm0 = vcmask 261120   ;;  %v243_v0 = vld [vmem:[#allocation5] sm:$0xff]  ;;  %v244_v1 = vld [vmem:[#allocation5 + $0x8] sm:$0xff]  ;;  %s235_s20 = scalar_lea.vmem [#allocation7], %s470_s29 }
  0x5b   : > { %v245_v2 = vld [vmem:[#allocation5 + $0x10] sm:$0xff]  ;;  %v500_v3 = vpack.c.bf16 %v244_v1, %v243_v0  ;;  %v246_v4 = vld [vmem:[#allocation5 + $0x18] sm:$0xff]  ;;  %s353_s22 = sshll.u32 %s235_s20, 4  ;;  %v473_v8 = vld [vmem:[%s992_s2] ss:$0 sm:$0xff]  ;;  %s482_s11 = sshll.u32 %s721_s15, 8  ;;  %s934_s22 = int_to_ptr.vmem [resolvable:$true] %s353_s22 }
  0x5c   : > { %v241_v5 = vld [vmem:[%s206_s8] sm:$0xff]  ;;  %v504_v6 = vpack.c.bf16 %v246_v4, %v245_v2  ;;  %v242_v7 = vld [vmem:[%s206_s8 + $0x8] sm:$0xff]  ;;  %s939_s19 = scalar_lea.hbm %s993_s3, %s482_s11  ;;  %s339_s25 = scalar_lea.sflag [#allocation4], %s916_s30 }
  0x5d   : > { %497 = vmatprep.mubr.msk.f32.mxu0 %vm254_vm0, %v241_v5  ;;  %501 = vmatprep.subr.bf16.mxu0 %v500_v3  ;;  %s643_s15 = scalar_lea.vmem %s934_s22, 256  ;;  %s735_s26 = smov [#allocation7]  }
  0x5e   : > { %503 = vmatpush3.bf16.msra.mxu0 %v500_v3  ;;  %p644_p13 = scmp.ne.s32.totalorder %s934_s22, %s643_s15  ;;  %s647_s21 = sshll.u32 %s735_s26, 4  ;;  %s648_s21 = int_to_ptr.vmem [resolvable:$false] %s647_s21 }
  0x5f   : > { %505 = vmatprep.subr.bf16.mxu0 %v504_v6  ;;  %s649_s4 = scalar_lea.vmem %s648_s21, 512  ;;  %p650_p12 = scmp.lt.s32.totalorder %s934_s22, %s648_s21 }
  0x60   : > { %p645_p6 = pnand %p644_p13, %p857_p10  ;;  %p651_p11 = scmp.lt.s32.totalorder %s649_s4, %s643_s15 }
  0x62   : > { %507 = vmatpush3.bf16.msra.mxu0 %v504_v6  ;;  %p646_p8 = pneg %p645_p6  ;;  %p652_p0 = por %p651_p11, %p650_p12 }
  0x64   : > { %p653_p5 = pnand %p652_p0, %p646_p8 }
  0x65   : > { %498 = vmatmul.mubr.msk.f32.vlgmr.msra.gmra.mrb[0].mxu0 %vm254_vm0, %v242_v7 }
 0x138   : > { %v499_v9 = vpop.f32.mrb[0].mxu0 }
 0x139   : > { %v333_v10 = vadd.f32 %v499_v9, %v473_v8  ;;  %v327_v11 = vpop.f32.mrb[1].mxu0 }
 0x13a   : > { %v328_v12 = vadd.f32 %v473_v8, %v327_v11 }
 0x13b   : > { %337 = vst.msk [vmem:[%s235_s20 + $0x8] sm:$0xff] %vm254_vm0, %v333_v10 }
 0x13c   : > { %336 = vst.msk [vmem:[%s235_s20] sm:$0xff] %vm254_vm0, %v328_v12 }
 0x13d   : > { %656 = shalt.err (!%p653_p5)
}
 0x13e   : > { %s657_s6 = scalar_lea.hbm %s939_s19, 256  ;;  %s661_s8 = scalar_lea.hbm %s993_s3, 512 }
 0x13f   : > { %p658_p9 = scmp.ne.s32.totalorder %s939_s19, %s657_s6  ;;  %p662_p3 = scmp.lt.u32.totalorder %s939_s19, %s993_s3 }
 0x140   : > { %p663_p7 = scmp.lt.u32.totalorder %s661_s8, %s657_s6  ;;  %p665_p13 = scmp.lt.u32.totalorder %s657_s6, %s939_s19 }
 0x141   : > { %p659_p1 = pnand %p658_p9, %p857_p10 }
 0x142   : > { %p664_p4 = por %p663_p7, %p662_p3 }
 0x143   : > { %p660_p2 = pneg %p659_p1 }
 0x144   : > { %p666_p6 = por %p665_p13, %p664_p4 }
 0x146   : > { %p667_p8 = pnand %p666_p6, %p660_p2 }
 0x148   : > { %670 = shalt.err (!%p667_p8)
}
 0x149   : > { %s736_s10 = smov 128   ;;  %s737_s11 = smov 8  }
 0x14a   : > { %514 = dma.vmem_to_hbm [thread:$0]  (%p857_p10), %s934_s22, 256, %s939_s19, %s339_s25, %s736_s10, %s736_s10, %s737_s11  }
 0x14b PF: > { %s368_s9 = sand.u32 1, %s709_s12   ;;  %p1011_p12 = scmp.ne.s32.totalorder %s1001_s23, 0 }
 0x14c   : > { %p1012_p11 = scmp.ge.s32.totalorder %s729_s17, 2  ;;  %s369_s18 = scalar_lea.sflag [#allocation4], %s368_s9 }
 0x14e   : > { %p525_p0 = pnand %p1012_p11, %p1011_p12 }
 0x150   : > { %704 = dma.done.wait (!%p525_p0), %s369_s18, 256  }
 0x151   : > { %706 = vsyncadd (!%p525_p0), %s369_s18, 4294967040  ;;  %s20_s17 = sadd.s32 1, %s729_s17   ;;  %s1013_s12 = smov %s713_s13 }
 0x152   : > { %p17_p5 = scmp.ge.s32.totalorder %s20_s17, 4   ;;  %s1014_s13 = smov %s717_s14 }
 0x153   : > { %s1015_s14 = smov %s866_s5  ;;  %s1016_s15 = smov %s725_s16 }
 0x154   : > { %s1017_s16 = smov %s1019_s28  ;;  %19 = sbr.rel (!%p17_p5) target bundleno = 7 (0x7), region = 85 }
 0x15b   :  { %374 = vsyncpa [#allocation3], 1 }
 0x15c   :  { %376 = vsyncpa [#allocation3 + $0x1], 1 }
 0x15d   :  { %377 = vsyncpa [#allocation6], 1 }
 0x15e   :  { %378 = vsyncpa [#allocation4], 1 }
 0x15f   :  { %380 = vsyncpa [#allocation4 + $0x1], 1 }

</bundles_post_ra>
